<compile_context>
chip_gen: v7x
topology: tpu7x:2x2x1
jax: 0.10.0
libtpu: 0.0.40
codegen_flags: <defaults>
</compile_context>

<pallas_src>
import functools

import jax
import jax.numpy as jnp
from jax.experimental import pallas as pl
from jax.experimental.pallas import tpu as pltpu

_LANE = 128           # TPU lane width: keep the last dim lane-dense.
_MAX_TILE_ROWS = 1024 # 1024 x 128 x 4B = 512 KiB per input block.


def _round_up(n, m):
    return -(-n // m) * m


def _pick_tile_rows(n_elems):
    rows = _round_up(max(int(n_elems), 1), _LANE) // _LANE
    rows8 = _round_up(rows, 8)            # satisfy the (8, 128) tiling rule
    return min(_MAX_TILE_ROWS, rows8)


def _flatten_pad(x, tile_rows):
    """Flatten to 1-D, zero-pad, reshape to a lane-dense (rows_padded, 128) slab."""
    n = int(x.size)
    flat = x.reshape(-1).astype(jnp.float32)
    rows = _round_up(max(n, 1), _LANE) // _LANE
    rows_p = _round_up(rows, tile_rows)
    pad = rows_p * _LANE - n
    if pad:
        flat = jnp.pad(flat, (0, pad))    # zeros: neutral for sum and |x - y|
    return flat.reshape(rows_p, _LANE), n


# ----------------------------------------------------------------------------
# Tiled scalar reductions (P3 accumulator pattern: SMEM scratch, pl.when
# init on the first grid step, write the output on the last grid step).
# ----------------------------------------------------------------------------
def _sum_kernel(x_ref, o_ref, acc_ref):
    @pl.when(pl.program_id(0) == 0)
    def _():
        acc_ref[0] = jnp.float32(0.0)

    acc_ref[0] += jnp.sum(x_ref[...])

    @pl.when(pl.program_id(0) == pl.num_programs(0) - 1)
    def _():
        o_ref[0, 0] = acc_ref[0]


def _l1_sum_kernel(x_ref, y_ref, o_ref, acc_ref):
    @pl.when(pl.program_id(0) == 0)
    def _():
        acc_ref[0] = jnp.float32(0.0)

    acc_ref[0] += jnp.sum(jnp.abs(x_ref[...] - y_ref[...]))

    @pl.when(pl.program_id(0) == pl.num_programs(0) - 1)
    def _():
        o_ref[0, 0] = acc_ref[0]


def _pallas_sum(x):
    """sum(x) as a tiled Pallas reduction; returns (scalar_sum, num_elements)."""
    tile_rows = _pick_tile_rows(x.size)
    x2, n = _flatten_pad(x, tile_rows)
    grid = (x2.shape[0] // tile_rows,)
    s = pl.pallas_call(
        _sum_kernel,
        out_shape=jax.ShapeDtypeStruct((1, 1), jnp.float32),
        grid=grid,
        in_specs=[pl.BlockSpec((tile_rows, _LANE), lambda i: (i, 0))],
        out_specs=pl.BlockSpec(memory_space=pltpu.MemorySpace.SMEM),
        scratch_shapes=[pltpu.SMEM((1,), jnp.float32)],
        compiler_params=pltpu.CompilerParams(
            dimension_semantics=("arbitrary",)),
    )(x2)
    return s[0, 0], n


def l1_mean(x, y):
    """nn.L1Loss(): mean(|x - y|), tiled Pallas reduction."""
    assert x.shape == y.shape, (x.shape, y.shape)
    tile_rows = _pick_tile_rows(x.size)
    x2, n = _flatten_pad(x, tile_rows)
    y2, _ = _flatten_pad(y, tile_rows)
    grid = (x2.shape[0] // tile_rows,)
    s = pl.pallas_call(
        _l1_sum_kernel,
        out_shape=jax.ShapeDtypeStruct((1, 1), jnp.float32),
        grid=grid,
        in_specs=[pl.BlockSpec((tile_rows, _LANE), lambda i: (i, 0)),
                  pl.BlockSpec((tile_rows, _LANE), lambda i: (i, 0))],
        out_specs=pl.BlockSpec(memory_space=pltpu.MemorySpace.SMEM),
        scratch_shapes=[pltpu.SMEM((1,), jnp.float32)],
        compiler_params=pltpu.CompilerParams(
            dimension_semantics=("arbitrary",)),
    )(x2, y2)
    return s[0, 0] / jnp.float32(n)


def neg_mean(r_hat):
    """-r_hat.mean() via the tiled Pallas sum kernel."""
    s, n = _pallas_sum(r_hat)
    return -(s / jnp.float32(n))


# ----------------------------------------------------------------------------
# LossAdv.forward
# ----------------------------------------------------------------------------
def loss_adv(r_hat, D_res_list, D_hat_res_list, FM_weight=1.0):
    lossFM = jnp.float32(0.0)
    for res, res_hat in zip(D_res_list, D_hat_res_list):
        lossFM = lossFM + l1_mean(res, res_hat)
    return neg_mean(r_hat) + lossFM * jnp.float32(FM_weight)


def _loss_adv_ref(r_hat, D_res_list, D_hat_res_list, FM_weight=1.0):
    """Pure-JAX reference (mirrors the PyTorch module exactly)."""
    lossFM = jnp.float32(0.0)
    for res, res_hat in zip(D_res_list, D_hat_res_list):
        lossFM = lossFM + jnp.mean(jnp.abs(res.astype(jnp.float32)
                                           - res_hat.astype(jnp.float32)))
    return -jnp.mean(r_hat.astype(jnp.float32)) + lossFM * jnp.float32(FM_weight)


if __name__ == "__main__":
    key = jax.random.PRNGKey(0)
    keys = jax.random.split(key, 7)

    # Small, module-consistent shapes: r_hat = discriminator realness scores,
    # D_res_list / D_hat_res_list = intermediate discriminator feature maps.
    r_hat = jax.random.normal(keys[0], (2, 1), jnp.float32)
    feat_shapes = [(2, 32, 16, 16), (2, 64, 8, 8), (2, 128, 4, 4)]
    D_res_list = [jax.random.normal(keys[1 + i], s, jnp.float32)
                  for i, s in enumerate(feat_shapes)]
    D_hat_res_list = [jax.random.normal(keys[4 + i], s, jnp.float32)
                      for i, s in enumerate(feat_shapes)]

    loss_fn = jax.jit(functools.partial(loss_adv, FM_weight=1.0))
    loss = loss_fn(r_hat, D_res_list, D_hat_res_list)
    jax.block_until_ready(loss)

    ref = _loss_adv_ref(r_hat, D_res_list, D_hat_res_list, 1.0)
    assert jnp.allclose(loss, ref, rtol=1e-5, atol=1e-5), (float(loss), float(ref))
    print("KERNEL_OK")
</pallas_src>

<mosaic_0001>
module attributes {stable_mosaic.version = 11 : i64} {
  func.func @_l1_sum_kernel(%arg0: i32, %arg1: memref<128x128xf32, #tpu.memory_space<vmem>>, %arg2: memref<128x128xf32, #tpu.memory_space<vmem>>, %arg3: memref<1x1xf32, #tpu.memory_space<smem>>, %arg4: memref<1xf32, #tpu.memory_space<smem>>) attributes {dimension_semantics = [#tpu.dimension_semantics<arbitrary>], iteration_bounds = array<i64: 1>, scalar_prefetch = 0 : i64, scratch_operands = 1 : i64, tpu.core_type = #tpu.core_type<tc>, window_params = [{transform_indices = @transform_0, window_bounds = array<i64: 128, 128>}, {transform_indices = @transform_1, window_bounds = array<i64: 128, 128>}, {transform_indices = @transform_2, window_bounds = array<i64: 1, 1>}]} {
    %c0_i32 = arith.constant 0 : i32
    %0 = arith.cmpi eq, %arg0, %c0_i32 : i32
    %1 = arith.extui %0 : i1 to i32
    %c0_i32_0 = arith.constant 0 : i32
    %2 = arith.cmpi ne, %1, %c0_i32_0 : i32
    scf.if %2 {
      %cst_8 = arith.constant 0.000000e+00 : f32
      %c0_9 = arith.constant 0 : index
      %17 = memref.load %arg4[%c0_9] : memref<1xf32, #tpu.memory_space<smem>>
      memref.store %cst_8, %arg4[%c0_9] : memref<1xf32, #tpu.memory_space<smem>>
    } else {
    }
    %c0 = arith.constant 0 : index
    %3 = memref.load %arg4[%c0] : memref<1xf32, #tpu.memory_space<smem>>
    %c0_1 = arith.constant 0 : index
    %c0_2 = arith.constant 0 : index
    %4 = vector.load %arg1[%c0_1, %c0_2] : memref<128x128xf32, #tpu.memory_space<vmem>>, vector<128x128xf32>
    %c0_3 = arith.constant 0 : index
    %c0_4 = arith.constant 0 : index
    %5 = vector.load %arg2[%c0_3, %c0_4] : memref<128x128xf32, #tpu.memory_space<vmem>>, vector<128x128xf32>
    %6 = arith.subf %4, %5 : vector<128x128xf32>
    %7 = math.absf %6 : vector<128x128xf32>
    %8 = vector.shape_cast %7 : vector<128x128xf32> to vector<1x128x128xf32>
    %cst = arith.constant dense<0.000000e+00> : vector<1xf32>
    %9 = vector.multi_reduction <add>, %8, %cst [1, 2] : vector<1x128x128xf32> to vector<1xf32>
    %10 = vector.shape_cast %9 : vector<1xf32> to vector<1x1x1xf32>
    %11 = vector.extract %10[0, 0, 0] : f32 from vector<1x1x1xf32>
    %12 = arith.addf %3, %11 : f32
    %c0_5 = arith.constant 0 : index
    %13 = memref.load %arg4[%c0_5] : memref<1xf32, #tpu.memory_space<smem>>
    memref.store %12, %arg4[%c0_5] : memref<1xf32, #tpu.memory_space<smem>>
    %c0_i32_6 = arith.constant 0 : i32
    %14 = arith.cmpi eq, %arg0, %c0_i32_6 : i32
    %15 = arith.extui %14 : i1 to i32
    %c0_i32_7 = arith.constant 0 : i32
    %16 = arith.cmpi ne, %15, %c0_i32_7 : i32
    scf.if %16 {
      %c0_8 = arith.constant 0 : index
      %17 = memref.load %arg4[%c0_8] : memref<1xf32, #tpu.memory_space<smem>>
      %c0_9 = arith.constant 0 : index
      %c0_10 = arith.constant 0 : index
      %18 = memref.load %arg3[%c0_9, %c0_10] : memref<1x1xf32, #tpu.memory_space<smem>>
      memref.store %17, %arg3[%c0_9, %c0_10] : memref<1x1xf32, #tpu.memory_space<smem>>
    } else {
    }
    return
  }
  func.func @transform_0(%arg0: i32) -> (i32, i32) {
    %c0_i32 = arith.constant 0 : i32
    %c0_i32_0 = arith.constant 0 : i32
    return %arg0, %c0_i32 : i32, i32
  }
  func.func @transform_1(%arg0: i32) -> (i32, i32) {
    %c0_i32 = arith.constant 0 : i32
    %c0_i32_0 = arith.constant 0 : i32
    return %arg0, %c0_i32 : i32, i32
  }
  func.func @transform_2(%arg0: i32) -> (i32, i32) {
    %c0_i32 = arith.constant 0 : i32
    %c0_i32_0 = arith.constant 0 : i32
    %c0_i32_1 = arith.constant 0 : i32
    return %c0_i32, %c0_i32_0 : i32, i32
  }
}

module attributes {stable_mosaic.version = 11 : i64} {
  func.func @_l1_sum_kernel(%arg0: i32, %arg1: memref<64x128xf32, #tpu.memory_space<vmem>>, %arg2: memref<64x128xf32, #tpu.memory_space<vmem>>, %arg3: memref<1x1xf32, #tpu.memory_space<smem>>, %arg4: memref<1xf32, #tpu.memory_space<smem>>) attributes {dimension_semantics = [#tpu.dimension_semantics<arbitrary>], iteration_bounds = array<i64: 1>, scalar_prefetch = 0 : i64, scratch_operands = 1 : i64, tpu.core_type = #tpu.core_type<tc>, window_params = [{transform_indices = @transform_0, window_bounds = array<i64: 64, 128>}, {transform_indices = @transform_1, window_bounds = array<i64: 64, 128>}, {transform_indices = @transform_2, window_bounds = array<i64: 1, 1>}]} {
    %c0_i32 = arith.constant 0 : i32
    %0 = arith.cmpi eq, %arg0, %c0_i32 : i32
    %1 = arith.extui %0 : i1 to i32
    %c0_i32_0 = arith.constant 0 : i32
    %2 = arith.cmpi ne, %1, %c0_i32_0 : i32
    scf.if %2 {
      %cst_8 = arith.constant 0.000000e+00 : f32
      %c0_9 = arith.constant 0 : index
      %17 = memref.load %arg4[%c0_9] : memref<1xf32, #tpu.memory_space<smem>>
      memref.store %cst_8, %arg4[%c0_9] : memref<1xf32, #tpu.memory_space<smem>>
    } else {
    }
    %c0 = arith.constant 0 : index
    %3 = memref.load %arg4[%c0] : memref<1xf32, #tpu.memory_space<smem>>
    %c0_1 = arith.constant 0 : index
    %c0_2 = arith.constant 0 : index
    %4 = vector.load %arg1[%c0_1, %c0_2] : memref<64x128xf32, #tpu.memory_space<vmem>>, vector<64x128xf32>
    %c0_3 = arith.constant 0 : index
    %c0_4 = arith.constant 0 : index
    %5 = vector.load %arg2[%c0_3, %c0_4] : memref<64x128xf32, #tpu.memory_space<vmem>>, vector<64x128xf32>
    %6 = arith.subf %4, %5 : vector<64x128xf32>
    %7 = math.absf %6 : vector<64x128xf32>
    %8 = vector.shape_cast %7 : vector<64x128xf32> to vector<1x64x128xf32>
    %cst = arith.constant dense<0.000000e+00> : vector<1xf32>
    %9 = vector.multi_reduction <add>, %8, %cst [1, 2] : vector<1x64x128xf32> to vector<1xf32>
    %10 = vector.shape_cast %9 : vector<1xf32> to vector<1x1x1xf32>
    %11 = vector.extract %10[0, 0, 0] : f32 from vector<1x1x1xf32>
    %12 = arith.addf %3, %11 : f32
    %c0_5 = arith.constant 0 : index
    %13 = memref.load %arg4[%c0_5] : memref<1xf32, #tpu.memory_space<smem>>
    memref.store %12, %arg4[%c0_5] : memref<1xf32, #tpu.memory_space<smem>>
    %c0_i32_6 = arith.constant 0 : i32
    %14 = arith.cmpi eq, %arg0, %c0_i32_6 : i32
    %15 = arith.extui %14 : i1 to i32
    %c0_i32_7 = arith.constant 0 : i32
    %16 = arith.cmpi ne, %15, %c0_i32_7 : i32
    scf.if %16 {
      %c0_8 = arith.constant 0 : index
      %17 = memref.load %arg4[%c0_8] : memref<1xf32, #tpu.memory_space<smem>>
      %c0_9 = arith.constant 0 : index
      %c0_10 = arith.constant 0 : index
      %18 = memref.load %arg3[%c0_9, %c0_10] : memref<1x1xf32, #tpu.memory_space<smem>>
      memref.store %17, %arg3[%c0_9, %c0_10] : memref<1x1xf32, #tpu.memory_space<smem>>
    } else {
    }
    return
  }
  func.func @transform_0(%arg0: i32) -> (i32, i32) {
    %c0_i32 = arith.constant 0 : i32
    %c0_i32_0 = arith.constant 0 : i32
    return %arg0, %c0_i32 : i32, i32
  }
  func.func @transform_1(%arg0: i32) -> (i32, i32) {
    %c0_i32 = arith.constant 0 : i32
    %c0_i32_0 = arith.constant 0 : i32
    return %arg0, %c0_i32 : i32, i32
  }
  func.func @transform_2(%arg0: i32) -> (i32, i32) {
    %c0_i32 = arith.constant 0 : i32
    %c0_i32_0 = arith.constant 0 : i32
    %c0_i32_1 = arith.constant 0 : i32
    return %c0_i32, %c0_i32_0 : i32, i32
  }
}

module attributes {stable_mosaic.version = 11 : i64} {
  func.func @_l1_sum_kernel(%arg0: i32, %arg1: memref<32x128xf32, #tpu.memory_space<vmem>>, %arg2: memref<32x128xf32, #tpu.memory_space<vmem>>, %arg3: memref<1x1xf32, #tpu.memory_space<smem>>, %arg4: memref<1xf32, #tpu.memory_space<smem>>) attributes {dimension_semantics = [#tpu.dimension_semantics<arbitrary>], iteration_bounds = array<i64: 1>, scalar_prefetch = 0 : i64, scratch_operands = 1 : i64, tpu.core_type = #tpu.core_type<tc>, window_params = [{transform_indices = @transform_0, window_bounds = array<i64: 32, 128>}, {transform_indices = @transform_1, window_bounds = array<i64: 32, 128>}, {transform_indices = @transform_2, window_bounds = array<i64: 1, 1>}]} {
    %c0_i32 = arith.constant 0 : i32
    %0 = arith.cmpi eq, %arg0, %c0_i32 : i32
    %1 = arith.extui %0 : i1 to i32
    %c0_i32_0 = arith.constant 0 : i32
    %2 = arith.cmpi ne, %1, %c0_i32_0 : i32
    scf.if %2 {
      %cst_8 = arith.constant 0.000000e+00 : f32
      %c0_9 = arith.constant 0 : index
      %17 = memref.load %arg4[%c0_9] : memref<1xf32, #tpu.memory_space<smem>>
      memref.store %cst_8, %arg4[%c0_9] : memref<1xf32, #tpu.memory_space<smem>>
    } else {
    }
    %c0 = arith.constant 0 : index
    %3 = memref.load %arg4[%c0] : memref<1xf32, #tpu.memory_space<smem>>
    %c0_1 = arith.constant 0 : index
    %c0_2 = arith.constant 0 : index
    %4 = vector.load %arg1[%c0_1, %c0_2] : memref<32x128xf32, #tpu.memory_space<vmem>>, vector<32x128xf32>
    %c0_3 = arith.constant 0 : index
    %c0_4 = arith.constant 0 : index
    %5 = vector.load %arg2[%c0_3, %c0_4] : memref<32x128xf32, #tpu.memory_space<vmem>>, vector<32x128xf32>
    %6 = arith.subf %4, %5 : vector<32x128xf32>
    %7 = math.absf %6 : vector<32x128xf32>
    %8 = vector.shape_cast %7 : vector<32x128xf32> to vector<1x32x128xf32>
    %cst = arith.constant dense<0.000000e+00> : vector<1xf32>
    %9 = vector.multi_reduction <add>, %8, %cst [1, 2] : vector<1x32x128xf32> to vector<1xf32>
    %10 = vector.shape_cast %9 : vector<1xf32> to vector<1x1x1xf32>
    %11 = vector.extract %10[0, 0, 0] : f32 from vector<1x1x1xf32>
    %12 = arith.addf %3, %11 : f32
    %c0_5 = arith.constant 0 : index
    %13 = memref.load %arg4[%c0_5] : memref<1xf32, #tpu.memory_space<smem>>
    memref.store %12, %arg4[%c0_5] : memref<1xf32, #tpu.memory_space<smem>>
    %c0_i32_6 = arith.constant 0 : i32
    %14 = arith.cmpi eq, %arg0, %c0_i32_6 : i32
    %15 = arith.extui %14 : i1 to i32
    %c0_i32_7 = arith.constant 0 : i32
    %16 = arith.cmpi ne, %15, %c0_i32_7 : i32
    scf.if %16 {
      %c0_8 = arith.constant 0 : index
      %17 = memref.load %arg4[%c0_8] : memref<1xf32, #tpu.memory_space<smem>>
      %c0_9 = arith.constant 0 : index
      %c0_10 = arith.constant 0 : index
      %18 = memref.load %arg3[%c0_9, %c0_10] : memref<1x1xf32, #tpu.memory_space<smem>>
      memref.store %17, %arg3[%c0_9, %c0_10] : memref<1x1xf32, #tpu.memory_space<smem>>
    } else {
    }
    return
  }
  func.func @transform_0(%arg0: i32) -> (i32, i32) {
    %c0_i32 = arith.constant 0 : i32
    %c0_i32_0 = arith.constant 0 : i32
    return %arg0, %c0_i32 : i32, i32
  }
  func.func @transform_1(%arg0: i32) -> (i32, i32) {
    %c0_i32 = arith.constant 0 : i32
    %c0_i32_0 = arith.constant 0 : i32
    return %arg0, %c0_i32 : i32, i32
  }
  func.func @transform_2(%arg0: i32) -> (i32, i32) {
    %c0_i32 = arith.constant 0 : i32
    %c0_i32_0 = arith.constant 0 : i32
    %c0_i32_1 = arith.constant 0 : i32
    return %c0_i32, %c0_i32_0 : i32, i32
  }
}

module attributes {stable_mosaic.version = 11 : i64} {
  func.func @_sum_kernel(%arg0: i32, %arg1: memref<8x128xf32, #tpu.memory_space<vmem>>, %arg2: memref<1x1xf32, #tpu.memory_space<smem>>, %arg3: memref<1xf32, #tpu.memory_space<smem>>) attributes {dimension_semantics = [#tpu.dimension_semantics<arbitrary>], iteration_bounds = array<i64: 1>, scalar_prefetch = 0 : i64, scratch_operands = 1 : i64, tpu.core_type = #tpu.core_type<tc>, window_params = [{transform_indices = @transform_0, window_bounds = array<i64: 8, 128>}, {transform_indices = @transform_1, window_bounds = array<i64: 1, 1>}]} {
    %c0_i32 = arith.constant 0 : i32
    %0 = arith.cmpi eq, %arg0, %c0_i32 : i32
    %1 = arith.extui %0 : i1 to i32
    %c0_i32_0 = arith.constant 0 : i32
    %2 = arith.cmpi ne, %1, %c0_i32_0 : i32
    scf.if %2 {
      %cst_6 = arith.constant 0.000000e+00 : f32
      %c0_7 = arith.constant 0 : index
      %14 = memref.load %arg3[%c0_7] : memref<1xf32, #tpu.memory_space<smem>>
      memref.store %cst_6, %arg3[%c0_7] : memref<1xf32, #tpu.memory_space<smem>>
    } else {
    }
    %c0 = arith.constant 0 : index
    %3 = memref.load %arg3[%c0] : memref<1xf32, #tpu.memory_space<smem>>
    %c0_1 = arith.constant 0 : index
    %c0_2 = arith.constant 0 : index
    %4 = vector.load %arg1[%c0_1, %c0_2] : memref<8x128xf32, #tpu.memory_space<vmem>>, vector<8x128xf32>
    %5 = vector.shape_cast %4 : vector<8x128xf32> to vector<1x8x128xf32>
    %cst = arith.constant dense<0.000000e+00> : vector<1xf32>
    %6 = vector.multi_reduction <add>, %5, %cst [1, 2] : vector<1x8x128xf32> to vector<1xf32>
    %7 = vector.shape_cast %6 : vector<1xf32> to vector<1x1x1xf32>
    %8 = vector.extract %7[0, 0, 0] : f32 from vector<1x1x1xf32>
    %9 = arith.addf %3, %8 : f32
    %c0_3 = arith.constant 0 : index
    %10 = memref.load %arg3[%c0_3] : memref<1xf32, #tpu.memory_space<smem>>
    memref.store %9, %arg3[%c0_3] : memref<1xf32, #tpu.memory_space<smem>>
    %c0_i32_4 = arith.constant 0 : i32
    %11 = arith.cmpi eq, %arg0, %c0_i32_4 : i32
    %12 = arith.extui %11 : i1 to i32
    %c0_i32_5 = arith.constant 0 : i32
    %13 = arith.cmpi ne, %12, %c0_i32_5 : i32
    scf.if %13 {
      %c0_6 = arith.constant 0 : index
      %14 = memref.load %arg3[%c0_6] : memref<1xf32, #tpu.memory_space<smem>>
      %c0_7 = arith.constant 0 : index
      %c0_8 = arith.constant 0 : index
      %15 = memref.load %arg2[%c0_7, %c0_8] : memref<1x1xf32, #tpu.memory_space<smem>>
      memref.store %14, %arg2[%c0_7, %c0_8] : memref<1x1xf32, #tpu.memory_space<smem>>
    } else {
    }
    return
  }
  func.func @transform_0(%arg0: i32) -> (i32, i32) {
    %c0_i32 = arith.constant 0 : i32
    %c0_i32_0 = arith.constant 0 : i32
    return %arg0, %c0_i32 : i32, i32
  }
  func.func @transform_1(%arg0: i32) -> (i32, i32) {
    %c0_i32 = arith.constant 0 : i32
    %c0_i32_0 = arith.constant 0 : i32
    %c0_i32_1 = arith.constant 0 : i32
    return %c0_i32, %c0_i32_0 : i32, i32
  }
}

</mosaic_0001>

<bundles_post_ra>
// kernel: loss_adv.4
= control target key start
LH: loop header
LB: loop body
LE: loop exit
PB: predicated region body
PF: predicated region fallthrough
CT: control target
= control target key end

     0   :  { %s268_s0 = inlined_call_operand.vmem [shape: f32[128,128], index: 0, kind: input, shape index: {}]   ;;  %s269_s1 = inlined_call_operand.vmem [shape: f32[128,128], index: 1, kind: input, shape index: {}]   ;;  %s270_s2 = inlined_call_operand.hbm [shape: f32[1,1], index: 2, kind: output, shape index: {}]  }
   0x1   :  { %v19_v0 = vld [vmem:[%s268_s0] sm:$0xff]  ;;  %v20_v1 = vld [vmem:[%s268_s0 + $0x8] sm:$0xff]  ;;  %v21_v2 = vld [vmem:[%s268_s0 + $0x10] sm:$0xff] }
   0x2   :  { %v22_v3 = vld [vmem:[%s268_s0 + $0x18] sm:$0xff]  ;;  %v35_v4 = vld [vmem:[%s269_s1] sm:$0xff]  ;;  %v36_v5 = vld [vmem:[%s269_s1 + $0x8] sm:$0xff] }
   0x3   :  { %v37_v6 = vld [vmem:[%s269_s1 + $0x10] sm:$0xff]  ;;  %v38_v7 = vld [vmem:[%s269_s1 + $0x18] sm:$0xff]  ;;  %v51_v8 = vsub.f32 %v19_v0, %v35_v4  ;;  %v52_v9 = vsub.f32 %v20_v1, %v36_v5  ;;  %v23_v10 = vld [vmem:[%s268_s0 + $0x20] sm:$0xff] }
   0x4   :  { %v39_v11 = vld [vmem:[%s269_s1 + $0x20] sm:$0xff]  ;;  %v53_v12 = vsub.f32 %v21_v2, %v37_v6  ;;  %v54_v13 = vsub.f32 %v22_v3, %v38_v7  ;;  %v24_v15 = vld [vmem:[%s268_s0 + $0x28] sm:$0xff] }
   0x5   :  { %v67_v14 = vand.u32 2147483647, %v51_v8  ;;  %v40_v16 = vld [vmem:[%s269_s1 + $0x28] sm:$0xff]  ;;  %v68_v17 = vand.u32 2147483647, %v52_v9  ;;  %v55_v18 = vsub.f32 %v23_v10, %v39_v11 }
   0x6   :  { %v69_v19 = vand.u32 2147483647, %v53_v12 }
   0x7   :  { %7 = vsyncpa [#allocation4], 0  ;;  %v25_v20 = vld [vmem:[%s268_s0 + $0x30] sm:$0xff]  ;;  %v56_v22 = vsub.f32 %v24_v15, %v40_v16  ;;  %v70_v23 = vand.u32 2147483647, %v54_v13  ;;  %v83_v24 = vadd.f32 %v68_v17, %v67_v14  ;;  %v26_v25 = vld [vmem:[%s268_s0 + $0x38] sm:$0xff] }
   0x8   :  { %v41_v21 = vld [vmem:[%s269_s1 + $0x30] sm:$0xff]  ;;  %v42_v26 = vld [vmem:[%s269_s1 + $0x38] sm:$0xff]  ;;  %v71_v28 = vand.u32 2147483647, %v55_v18  ;;  %v27_v30 = vld [vmem:[%s268_s0 + $0x40] sm:$0xff]  ;;  %s132_s18 = scalar_lea.hbm %s270_s2, 16 }
   0x9   :  { %v57_v27 = vsub.f32 %v25_v20, %v41_v21  ;;  %v84_v29 = vadd.f32 %v83_v24, %v69_v19  ;;  %v43_v31 = vld [vmem:[%s269_s1 + $0x40] sm:$0xff]  ;;  %v58_v32 = vsub.f32 %v26_v25, %v42_v26  ;;  %v72_v33 = vand.u32 2147483647, %v56_v22  ;;  %v28_v35 = vld [vmem:[%s268_s0 + $0x48] sm:$0xff]  ;;  %v29_v40 = vld [vmem:[%s268_s0 + $0x50] sm:$0xff]  ;;  %p133_p0 = scmp.ne.s32.totalorder %s270_s2, %s132_s18  ;;  %p136_p1 = scmp.lt.u32.totalorder %s132_s18, %s270_s2 }
   0xa   :  { %v44_v36 = vld [vmem:[%s269_s1 + $0x48] sm:$0xff]  ;;  %v59_v37 = vsub.f32 %v27_v30, %v43_v31  ;;  %v45_v41 = vld [vmem:[%s269_s1 + $0x50] sm:$0xff]  ;;  %v30_v45 = vld [vmem:[%s268_s0 + $0x58] sm:$0xff] }
   0xb   :  { %v85_v34 = vadd.f32 %v84_v29, %v70_v23  ;;  %v73_v38 = vand.u32 2147483647, %v57_v27  ;;  %v60_v42 = vsub.f32 %v28_v35, %v44_v36  ;;  %v74_v43 = vand.u32 2147483647, %v58_v32  ;;  %v46_v46 = vld [vmem:[%s269_s1 + $0x58] sm:$0xff]  ;;  %v31_v50 = vld [vmem:[%s268_s0 + $0x60] sm:$0xff]  ;;  %p138_p2 = pnand %p136_p1, %p133_p0 }
   0xc   :  { %v61_v47 = vsub.f32 %v29_v40, %v45_v41  ;;  %v75_v48 = vand.u32 2147483647, %v59_v37  ;;  %v47_v51 = vld [vmem:[%s269_s1 + $0x60] sm:$0xff]  ;;  %v62_v52 = vsub.f32 %v30_v45, %v46_v46  ;;  %v32_v55 = vld [vmem:[%s268_s0 + $0x68] sm:$0xff]  ;;  %v33_v60 = vld [vmem:[%s268_s0 + $0x70] sm:$0xff] }
   0xd   :  { %v86_v39 = vadd.f32 %v85_v34, %v71_v28  ;;  %v76_v53 = vand.u32 2147483647, %v60_v42  ;;  %v48_v56 = vld [vmem:[%s269_s1 + $0x68] sm:$0xff]  ;;  %v63_v57 = vsub.f32 %v31_v50, %v47_v51  ;;  %v49_v61 = vld [vmem:[%s269_s1 + $0x70] sm:$0xff]  ;;  %v34_v1 = vld [vmem:[%s268_s0 + $0x78] sm:$0xff] }
   0xe   :  { %v77_v58 = vand.u32 2147483647, %v61_v47  ;;  %v64_v62 = vsub.f32 %v32_v55, %v48_v56  ;;  %v78_v63 = vand.u32 2147483647, %v62_v52  ;;  %v50_v2 = vld [vmem:[%s269_s1 + $0x78] sm:$0xff]  ;;  %v65_v3 = vsub.f32 %v33_v60, %v49_v61 }
   0xf   :  { %v87_v44 = vadd.f32 %v86_v39, %v72_v33  ;;  %v79_v4 = vand.u32 2147483647, %v63_v57  ;;  %v66_v6 = vsub.f32 %v34_v1, %v50_v2 }
  0x10   :  { %v80_v7 = vand.u32 2147483647, %v64_v62  ;;  %v81_v9 = vand.u32 2147483647, %v65_v3 }
  0x11   :  { %v88_v49 = vadd.f32 %v87_v44, %v73_v38  ;;  %v82_v11 = vand.u32 2147483647, %v66_v6 }
  0x13   :  { %v89_v54 = vadd.f32 %v88_v49, %v74_v43 }
  0x15   :  { %v90_v59 = vadd.f32 %v89_v54, %v75_v48 }
  0x17   :  { %v91_v0 = vadd.f32 %v90_v59, %v76_v53 }
  0x19   :  { %v92_v5 = vadd.f32 %v91_v0, %v77_v58 }
  0x1b   :  { %v93_v8 = vadd.f32 %v92_v5, %v78_v63 }
  0x1d   :  { %v94_v10 = vadd.f32 %v93_v8, %v79_v4 }
  0x1f   :  { %v95_v12 = vadd.f32 %v94_v10, %v80_v7 }
  0x21   :  { %v96_v13 = vadd.f32 %v95_v12, %v81_v9 }
  0x23   :  { %v97_v14 = vadd.f32 %v96_v13, %v82_v11 }
  0x25   :  { %98 = vadd.xlane.f32.xlu0 %v97_v14 }
  0xb2   :  { %v99_v15 = vpop.xlane.xlu0 %98 }
  0xb3   :  { %v100_v16 = vrot.slane %v99_v15, 4 }
  0xb5   :  { %v101_v17 = vadd.f32 %v100_v16, %v99_v15 }
  0xb7   :  { %v102_v18 = vrot.slane %v101_v17, 2 }
  0xb9   :  { %v103_v19 = vadd.f32 %v102_v18, %v101_v17 }
  0xbb   :  { %v104_v20 = vrot.slane %v103_v19, 1 }
  0xbd   :  { %v105_v21 = vadd.f32 %v104_v20, %v103_v19 }
  0xbf   :  { %129 = vpush %v105_v21 }
  0xf0   :  { %s130_s0 = spop %129 }
  0xf1   :  { %115 = sst [smem:[#allocation3]] %s130_s0 }
  0xf2   :  { %141 = shalt.err (!%p138_p2)
}
  0xf3   :  { %s144_s23 = smov [#allocation3]  }
  0xf4   :  { %123 = dma.smem_to_hbm %s144_s23, 16, %s270_s2, [#allocation4]  }
  0xf5   :  { %142 = dma.done.wait [#allocation4], 16  }
  0xf6   :  { %143 = vsyncadd [#allocation4], 4294967280 }
  0xf7   :  { %127 = sfence }
  0xf8   :  { %128 = vsyncpa [#allocation4], 1 }

// kernel: loss_adv.5
= control target key start
LH: loop header
LB: loop body
LE: loop exit
PB: predicated region body
PF: predicated region fallthrough
CT: control target
= control target key end

     0   :  { %s180_s0 = inlined_call_operand.vmem [shape: f32[64,128], index: 0, kind: input, shape index: {}]   ;;  %s181_s1 = inlined_call_operand.vmem [shape: f32[64,128], index: 1, kind: input, shape index: {}]   ;;  %s182_s2 = inlined_call_operand.hbm [shape: f32[1,1], index: 2, kind: output, shape index: {}]  }
   0x1   :  { %v19_v0 = vld [vmem:[%s180_s0] sm:$0xff]  ;;  %v20_v1 = vld [vmem:[%s180_s0 + $0x8] sm:$0xff]  ;;  %v21_v2 = vld [vmem:[%s180_s0 + $0x10] sm:$0xff] }
   0x2   :  { %v22_v3 = vld [vmem:[%s180_s0 + $0x18] sm:$0xff]  ;;  %v23_v4 = vld [vmem:[%s180_s0 + $0x20] sm:$0xff]  ;;  %v28_v6 = vld [vmem:[%s181_s1 + $0x8] sm:$0xff] }
   0x3   :  { %v27_v5 = vld [vmem:[%s181_s1] sm:$0xff]  ;;  %v29_v7 = vld [vmem:[%s181_s1 + $0x10] sm:$0xff]  ;;  %v30_v8 = vld [vmem:[%s181_s1 + $0x18] sm:$0xff]  ;;  %v36_v11 = vsub.f32 %v20_v1, %v28_v6 }
   0x4   :  { %v35_v9 = vsub.f32 %v19_v0, %v27_v5  ;;  %v31_v10 = vld [vmem:[%s181_s1 + $0x20] sm:$0xff]  ;;  %v37_v12 = vsub.f32 %v21_v2, %v29_v7  ;;  %v38_v13 = vsub.f32 %v22_v3, %v30_v8  ;;  %v24_v14 = vld [vmem:[%s180_s0 + $0x28] sm:$0xff] }
   0x5   :  { %v32_v15 = vld [vmem:[%s181_s1 + $0x28] sm:$0xff] }
   0x6   :  { %v43_v16 = vand.u32 2147483647, %v35_v9 }
   0x7   :  { %7 = vsyncpa [#allocation4], 0  ;;  %v39_v17 = vsub.f32 %v23_v4, %v31_v10  ;;  %v44_v18 = vand.u32 2147483647, %v36_v11  ;;  %v45_v19 = vand.u32 2147483647, %v37_v12  ;;  %v40_v22 = vsub.f32 %v24_v14, %v32_v15 }
   0x8   :  { %v25_v20 = vld [vmem:[%s180_s0 + $0x30] sm:$0xff]  ;;  %v46_v23 = vand.u32 2147483647, %v38_v13  ;;  %v26_v25 = vld [vmem:[%s180_s0 + $0x38] sm:$0xff]  ;;  %s92_s14 = scalar_lea.hbm %s182_s2, 16 }
   0x9   :  { %v33_v21 = vld [vmem:[%s181_s1 + $0x30] sm:$0xff]  ;;  %v51_v24 = vadd.f32 %v44_v18, %v43_v16  ;;  %v34_v26 = vld [vmem:[%s181_s1 + $0x38] sm:$0xff]  ;;  %v47_v28 = vand.u32 2147483647, %v39_v17  ;;  %v48_v31 = vand.u32 2147483647, %v40_v22  ;;  %p93_p0 = scmp.ne.s32.totalorder %s182_s2, %s92_s14  ;;  %p96_p1 = scmp.lt.u32.totalorder %s92_s14, %s182_s2 }
   0xa   :  { %v41_v27 = vsub.f32 %v25_v20, %v33_v21  ;;  %v42_v30 = vsub.f32 %v26_v25, %v34_v26 }
   0xb   :  { %v52_v29 = vadd.f32 %v51_v24, %v45_v19  ;;  %p98_p2 = pnand %p96_p1, %p93_p0 }
   0xc   :  { %v49_v33 = vand.u32 2147483647, %v41_v27  ;;  %v50_v35 = vand.u32 2147483647, %v42_v30 }
   0xd   :  { %v53_v32 = vadd.f32 %v52_v29, %v46_v23 }
   0xf   :  { %v54_v34 = vadd.f32 %v53_v32, %v47_v28 }
  0x11   :  { %v55_v36 = vadd.f32 %v54_v34, %v48_v31 }
  0x13   :  { %v56_v37 = vadd.f32 %v55_v36, %v49_v33 }
  0x15   :  { %v57_v38 = vadd.f32 %v56_v37, %v50_v35 }
  0x17   :  { %58 = vadd.xlane.f32.xlu0 %v57_v38 }
  0xa4   :  { %v59_v39 = vpop.xlane.xlu0 %58 }
  0xa5   :  { %v60_v40 = vrot.slane %v59_v39, 4 }
  0xa7   :  { %v61_v41 = vadd.f32 %v60_v40, %v59_v39 }
  0xa9   :  { %v62_v42 = vrot.slane %v61_v41, 2 }
  0xab   :  { %v63_v43 = vadd.f32 %v62_v42, %v61_v41 }
  0xad   :  { %v64_v44 = vrot.slane %v63_v43, 1 }
  0xaf   :  { %v65_v45 = vadd.f32 %v64_v44, %v63_v43 }
  0xb1   :  { %89 = vpush %v65_v45 }
  0xe2   :  { %s90_s0 = spop %89 }
  0xe3   :  { %75 = sst [smem:[#allocation3]] %s90_s0 }
  0xe4   :  { %101 = shalt.err (!%p98_p2)
}
  0xe5   :  { %s104_s19 = smov [#allocation3]  }
  0xe6   :  { %83 = dma.smem_to_hbm %s104_s19, 16, %s182_s2, [#allocation4]  }
  0xe7   :  { %102 = dma.done.wait [#allocation4], 16  }
  0xe8   :  { %103 = vsyncadd [#allocation4], 4294967280 }
  0xe9   :  { %87 = sfence }
  0xea   :  { %88 = vsyncpa [#allocation4], 1 }

// kernel: loss_adv.6
= control target key start
LH: loop header
LB: loop body
LE: loop exit
PB: predicated region body
PF: predicated region fallthrough
CT: control target
= control target key end

     0   :  { %s136_s0 = inlined_call_operand.vmem [shape: f32[32,128], index: 0, kind: input, shape index: {}]   ;;  %s137_s1 = inlined_call_operand.vmem [shape: f32[32,128], index: 1, kind: input, shape index: {}]   ;;  %s138_s2 = inlined_call_operand.hbm [shape: f32[1,1], index: 2, kind: output, shape index: {}]  }
   0x1   :  { %v19_v0 = vld [vmem:[%s136_s0] sm:$0xff]  ;;  %v20_v1 = vld [vmem:[%s136_s0 + $0x8] sm:$0xff]  ;;  %v21_v2 = vld [vmem:[%s136_s0 + $0x10] sm:$0xff] }
   0x2   :  { %v22_v3 = vld [vmem:[%s136_s0 + $0x18] sm:$0xff]  ;;  %v23_v4 = vld [vmem:[%s137_s1] sm:$0xff]  ;;  %v24_v5 = vld [vmem:[%s137_s1 + $0x8] sm:$0xff] }
   0x3   :  { %v25_v6 = vld [vmem:[%s137_s1 + $0x10] sm:$0xff]  ;;  %v26_v7 = vld [vmem:[%s137_s1 + $0x18] sm:$0xff]  ;;  %v27_v8 = vsub.f32 %v19_v0, %v23_v4  ;;  %v28_v9 = vsub.f32 %v20_v1, %v24_v5 }
   0x4   :  { %7 = vsyncpa [#allocation4], 0  ;;  %v29_v10 = vsub.f32 %v21_v2, %v25_v6  ;;  %v30_v11 = vsub.f32 %v22_v3, %v26_v7  ;;  %s72_s26 = scalar_lea.hbm %s138_s2, 16 }
   0x5   :  { %v31_v12 = vand.u32 2147483647, %v27_v8  ;;  %v32_v13 = vand.u32 2147483647, %v28_v9  ;;  %p73_p0 = scmp.ne.s32.totalorder %s138_s2, %s72_s26  ;;  %p76_p1 = scmp.lt.u32.totalorder %s72_s26, %s138_s2 }
   0x6   :  { %v33_v14 = vand.u32 2147483647, %v29_v10  ;;  %v34_v15 = vand.u32 2147483647, %v30_v11 }
   0x7   :  { %v35_v16 = vadd.f32 %v32_v13, %v31_v12  ;;  %p78_p2 = pnand %p76_p1, %p73_p0 }
   0x9   :  { %v36_v17 = vadd.f32 %v35_v16, %v33_v14 }
   0xb   :  { %v37_v18 = vadd.f32 %v36_v17, %v34_v15 }
   0xd   :  { %38 = vadd.xlane.f32.xlu0 %v37_v18 }
  0x9a   :  { %v39_v19 = vpop.xlane.xlu0 %38 }
  0x9b   :  { %v40_v20 = vrot.slane %v39_v19, 4 }
  0x9d   :  { %v41_v21 = vadd.f32 %v40_v20, %v39_v19 }
  0x9f   :  { %v42_v22 = vrot.slane %v41_v21, 2 }
  0xa1   :  { %v43_v23 = vadd.f32 %v42_v22, %v41_v21 }
  0xa3   :  { %v44_v24 = vrot.slane %v43_v23, 1 }
  0xa5   :  { %v45_v25 = vadd.f32 %v44_v24, %v43_v23 }
  0xa7   :  { %69 = vpush %v45_v25 }
  0xd8   :  { %s70_s0 = spop %69 }
  0xd9   :  { %55 = sst [smem:[#allocation3]] %s70_s0 }
  0xda   :  { %81 = shalt.err (!%p78_p2)
}
  0xdb   :  { %s84_s3 = smov [#allocation3]  }
  0xdc   :  { %63 = dma.smem_to_hbm %s84_s3, 16, %s138_s2, [#allocation4]  }
  0xdd   :  { %82 = dma.done.wait [#allocation4], 16  }
  0xde   :  { %83 = vsyncadd [#allocation4], 4294967280 }
  0xdf   :  { %67 = sfence }
  0xe0   :  { %68 = vsyncpa [#allocation4], 1 }

// kernel: loss_adv.7
= control target key start
LH: loop header
LB: loop body
LE: loop exit
PB: predicated region body
PF: predicated region fallthrough
CT: control target
= control target key end

     0   :  { %s89_s0 = inlined_call_operand.vmem [shape: f32[8,128], index: 0, kind: input, shape index: {}]   ;;  %s90_s1 = inlined_call_operand.hbm [shape: f32[1,1], index: 1, kind: output, shape index: {}]  }
   0x1   :  { %v16_v0 = vld [vmem:[%s89_s0] sm:$0xff] }
   0x2   :  { %6 = vsyncpa [#allocation4], 0  ;;  %17 = vadd.xlane.f32.xlu0 %v16_v0  ;;  %s51_s11 = scalar_lea.hbm %s90_s1, 16 }
   0x3   :  { %p52_p0 = scmp.ne.s32.totalorder %s90_s1, %s51_s11  ;;  %p55_p1 = scmp.lt.u32.totalorder %s51_s11, %s90_s1 }
   0x5   :  { %p57_p2 = pnand %p55_p1, %p52_p0 }
  0x8f   :  { %v18_v1 = vpop.xlane.xlu0 %17 }
  0x90   :  { %v19_v2 = vrot.slane %v18_v1, 4 }
  0x92   :  { %v20_v3 = vadd.f32 %v19_v2, %v18_v1 }
  0x94   :  { %v21_v4 = vrot.slane %v20_v3, 2 }
  0x96   :  { %v22_v5 = vadd.f32 %v21_v4, %v20_v3 }
  0x98   :  { %v23_v6 = vrot.slane %v22_v5, 1 }
  0x9a   :  { %v24_v7 = vadd.f32 %v23_v6, %v22_v5 }
  0x9c   :  { %48 = vpush %v24_v7 }
  0xcd   :  { %s49_s8 = spop %48 }
  0xce   :  { %34 = sst [smem:[#allocation3]] %s49_s8 }
  0xcf   :  { %60 = shalt.err (!%p57_p2)
}
  0xd0   :  { %s63_s15 = smov [#allocation3]  }
  0xd1   :  { %42 = dma.smem_to_hbm %s63_s15, 16, %s90_s1, [#allocation4]  }
  0xd2   :  { %61 = dma.done.wait [#allocation4], 16  }
  0xd3   :  { %62 = vsyncadd [#allocation4], 4294967280 }
  0xd4   :  { %46 = sfence }
  0xd5   :  { %47 = vsyncpa [#allocation4], 1 }

</bundles_post_ra>
